<compile_context>
chip_gen: v6e
topology: v6e:2x2x1
jax: 0.10.0
libtpu: 0.0.40
codegen_flags: <defaults>
</compile_context>

<pallas_src>
import numpy as np

import jax
import jax.numpy as jnp
from jax.experimental import pallas as pl
from jax.experimental.pallas import tpu as pltpu

_LANES = 128


# --------------------------------------------------------------------------
# Faithful base-class forward: abstract => identity => true no-op.
# --------------------------------------------------------------------------
def base_chatbot_forward(x):
    """BaseChatbotModel.forward is @abstractmethod: identity, zero kernels."""
    return x


# --------------------------------------------------------------------------
# Pallas kernels (used only when a materialized copy is explicitly wanted,
# or as a template for subclasses that add real compute).
# --------------------------------------------------------------------------
def _dma_copy_kernel(x_hbm, o_hbm, sem):
    # Direct HBM->HBM DMA: no VMEM staging, DMA engine drives HBM at roofline.
    cp = pltpu.make_async_copy(x_hbm, o_hbm, sem)
    cp.start()
    cp.wait()


def _copy_kernel(x_ref, o_ref):
    # Template body: subclasses would replace this with real compute.
    o_ref[...] = x_ref[...]


def _dma_identity(x):
    """Whole-array HBM->HBM DMA copy. Handles any shape / size."""
    return pl.pallas_call(
        _dma_copy_kernel,
        out_shape=jax.ShapeDtypeStruct(x.shape, x.dtype),
        in_specs=[pl.BlockSpec(memory_space=pl.ANY)],
        out_specs=pl.BlockSpec(memory_space=pl.ANY),
        scratch_shapes=[pltpu.SemaphoreType.DMA],
        cost_estimate=pl.CostEstimate(
            flops=0,
            transcendentals=0,
            bytes_accessed=2 * x.size * jnp.dtype(x.dtype).itemsize),
    )(x)


def _sublanes_for(itemsize):
    """Packed sublane count: 4-byte -> 8, 2-byte -> 16, 1-byte -> 32."""
    return {4: 8, 2: 16, 1: 32}.get(itemsize, 8)


def _vmem_budget():
    """(target_block_bytes, vmem_limit_bytes) tuned per TPU generation."""
    try:
        cap = pltpu.get_tpu_info().vmem_capacity_bytes
    except Exception:  # pragma: no cover - conservative fallback
        cap = 64 * 1024 * 1024
    if cap >= 128 * 1024 * 1024:          # v5e / v6e: 128 MiB physical VMEM
        return 8 * 1024 * 1024, 64 * 1024 * 1024
    return 4 * 1024 * 1024, 32 * 1024 * 1024  # v7x-class: 64 MiB physical VMEM


def _pick_cols(n):
    """Largest lane-dense (multiple-of-128) column count that divides n."""
    for cols in (4096, 2048, 1024, 512, 256, 128):
        if n % cols == 0:
            return cols
    return None


def _tiled_identity(x, cols):
    """Lane-dense, VMEM-staged tiled copy — template for real compute."""
    n = x.size
    itemsize = jnp.dtype(x.dtype).itemsize
    sub = _sublanes_for(itemsize)
    target_bytes, vmem_limit = _vmem_budget()

    rows = n // cols
    x2d = x.reshape(rows, cols)

    row_bytes = cols * itemsize
    tile_rows = max(sub, (target_bytes // row_bytes) // sub * sub)
    # Give the grid >=2 blocks when possible so both v7x TensorCores get work.
    if rows >= 2 * sub:
        half = max(sub, (pl.cdiv(rows, 2) // sub) * sub)
        tile_rows = min(tile_rows, half)
    tile_rows = min(rows, tile_rows)
    grid = (pl.cdiv(rows, tile_rows),)

    y2d = pl.pallas_call(
        _copy_kernel,
        out_shape=jax.ShapeDtypeStruct((rows, cols), x.dtype),
        grid=grid,
        in_specs=[pl.BlockSpec((tile_rows, cols), lambda i: (i, 0))],
        out_specs=pl.BlockSpec((tile_rows, cols), lambda i: (i, 0)),
        cost_estimate=pl.CostEstimate(
            flops=0, transcendentals=0, bytes_accessed=2 * n * itemsize),
        compiler_params=pltpu.CompilerParams(
            dimension_semantics=("parallel",),
            vmem_limit_bytes=vmem_limit),
    )(x2d)
    return y2d.reshape(x.shape)


def base_chatbot_forward_pallas(x, *, force_dma=False):
    """Identity through Pallas, for when a distinct output buffer is needed.

    Lane-divisible inputs use the tiled VMEM template (drop-in point for
    subclass compute); everything else uses a direct HBM->HBM DMA.
    """
    if x.size == 0:
        return x
    cols = None if force_dma else _pick_cols(x.size)
    if cols is None:
        return _dma_identity(x)
    return _tiled_identity(x, cols)


# TODO(synk): `forward` is @abstractmethod in BaseChatbotModel — no concrete
#             computation (matmul/attention/etc.) exists in the base class to
#             lower; subclasses would supply it inside _copy_kernel.
# TODO(synk): `generate_response` is an abstract autoregressive-decoding hook
#             with no body; it has no Pallas equivalent in the base class.


if __name__ == "__main__":
    key = jax.random.PRNGKey(0)
    k_small, k_ragged, k_big = jax.random.split(key, 3)

    # 1) Faithful base-class forward: true no-op (no kernel launched).
    x_small = jax.random.normal(k_small, (2, 8, 32), dtype=jnp.float32)
    y_small = base_chatbot_forward(x_small)
    jax.block_until_ready(y_small)
    assert y_small.shape == x_small.shape
    assert y_small.dtype == x_small.dtype
    assert np.array_equal(np.asarray(y_small), np.asarray(x_small))

    # 2) Materialized copy, ragged shape (not lane-divisible): HBM->HBM DMA.
    x_ragged = jax.random.normal(k_ragged, (3, 5, 7), dtype=jnp.float32)
    y_ragged = base_chatbot_forward_pallas(x_ragged)
    jax.block_until_ready(y_ragged)
    assert y_ragged.shape == x_ragged.shape
    assert np.allclose(np.asarray(y_ragged), np.asarray(x_ragged))

    # 3) Materialized copy, lane-dense 4 MiB input: tiled VMEM template.
    x_big = jax.random.normal(k_big, (4, 512, 512), dtype=jnp.float32)
    y_big = base_chatbot_forward_pallas(x_big)
    jax.block_until_ready(y_big)
    assert y_big.shape == x_big.shape
    assert np.allclose(np.asarray(y_big), np.asarray(x_big))

    print("KERNEL_OK")
</pallas_src>

<mosaic_0001>
module attributes {stable_mosaic.version = 11 : i64} {
  func.func @_dma_copy_kernel(%arg0: memref<3x5x7xf32, #tpu.memory_space<any>>, %arg1: memref<3x5x7xf32, #tpu.memory_space<any>>, %arg2: memref<!tpu.dma_semaphore, #tpu.memory_space<semaphore_mem>>) attributes {dimension_semantics = [], scalar_prefetch = 0 : i64, scratch_operands = 1 : i64, tpu.core_type = #tpu.core_type<tc>} {
    tpu.enqueue_dma source(%arg0 : memref<3x5x7xf32, #tpu.memory_space<any>>) target(%arg1 : memref<3x5x7xf32, #tpu.memory_space<any>>) target_semaphore(%arg2 : memref<!tpu.dma_semaphore, #tpu.memory_space<semaphore_mem>>)
    tpu.wait_dma2 semaphore(%arg2 : memref<!tpu.dma_semaphore, #tpu.memory_space<semaphore_mem>>) src(%arg0 : memref<3x5x7xf32, #tpu.memory_space<any>>) dst(%arg1 : memref<3x5x7xf32, #tpu.memory_space<any>>)
    return
  }
}

</mosaic_0001>

<bundles_post_ra>
// kernel: tpu_custom_call.1
= control target key start
LH: loop header
LB: loop body
LE: loop exit
PB: predicated region body
PF: predicated region fallthrough
CT: control target
= control target key end

     0   :  { %s123_s0 = inlined_call_operand.vmem [shape: f32[3,5,7], index: 0, kind: input, shape index: {}]   ;;  %s124_s1 = inlined_call_operand.vmem [shape: f32[3,5,7], index: 1, kind: output, shape index: {}]  }
   0x1   :  { %v24_v0 = vld [vmem:[%s123_s0] sm:$0x1f]  ;;  %v26_v1 = vld [vmem:[%s123_s0 + $0x8] sm:$0x1f]  ;;  %v28_v2 = vld [vmem:[%s123_s0 + $0x10] sm:$0x1f] }
   0x2   :  { %25 = vst [vmem:[%s124_s1] sm:$0x1f] %v24_v0  ;;  %27 = vst [vmem:[%s124_s1 + $0x8] sm:$0x1f] %v26_v1 }
   0x3   :  { %29 = vst [vmem:[%s124_s1 + $0x10] sm:$0x1f] %v28_v2 }
   0x4   :  { %67 = vsyncadd [#allocation2], 240 }
   0x5   :  { %93 = dma.done.wait [#allocation2], 240 }
   0x6   :  { %94 = vsyncadd [#allocation2], 4294967056 }
   0x7   :  { %72 = vsyncmov [#allocation2] }
   0xa   :  { %s73_s18 = vpop.sfrf %72 }
   0xb   :  { %p92_p0 = scmp.ne.s32.totalorder %s73_s18, 0 }
   0xd   :  { %77 = shalt.err (%p92_p0)  }

</bundles_post_ra>
